<compile_context>
chip_gen: v6e
topology: v6e:2x2x1
jax: 0.10.0
libtpu: 0.0.40
codegen_flags: <defaults>
</compile_context>

<pallas_src>
import functools

import jax
import jax.numpy as jnp
from jax.experimental import pallas as pl
from jax.experimental.pallas import tpu as pltpu


def _mgfe_kernel(x_ref, o_ref, *, split, inv_g, inv_u, inv_l, lane_aligned):
    # x_ref block: (Bt, C, HW); o_ref block: (Bt, 3, C)
    if lane_aligned:
        # split is a multiple of 128: ref slices stay on vreg lane-tile
        # boundaries, so reduce straight from the ref views.
        upper = jnp.sum(x_ref[:, :, :split], axis=-1, dtype=jnp.float32)   # (Bt, C)
        lower = jnp.sum(x_ref[:, :, split:], axis=-1, dtype=jnp.float32)   # (Bt, C)
        total = upper + lower
    else:
        # Unaligned split: avoid lane-crossing slices; mask on the lane index
        # (VPU work, which has plenty of slack in this HBM-bound kernel).
        x = x_ref[...]
        lane = jax.lax.broadcasted_iota(jnp.int32, x.shape, dimension=x.ndim - 1)
        total = jnp.sum(x, axis=-1, dtype=jnp.float32)
        upper = jnp.sum(jnp.where(lane < split, x, jnp.zeros_like(x)),
                        axis=-1, dtype=jnp.float32)
        lower = total - upper

    # Three sublane-slice stores (no lane-axis concat / XLU shifts).
    o_ref[:, 0:1, :] = (total * inv_g)[:, None, :].astype(o_ref.dtype)
    o_ref[:, 1:2, :] = (upper * inv_u)[:, None, :].astype(o_ref.dtype)
    o_ref[:, 2:3, :] = (lower * inv_l)[:, None, :].astype(o_ref.dtype)


def _vmem_capacity_bytes():
    try:
        info = pltpu.get_tpu_info()
        cap = getattr(info, "vmem_capacity_bytes", None)
        if cap:
            return int(cap)
    except Exception:
        pass
    return 64 << 20  # conservative fallback: v7x per-TC VMEM


def multi_granular_feature_extractor(x, *, P_parts=2):
    """x: (B, C, H, W) -> (B, 3*C) = [global mean | upper-half mean | lower-half mean]."""
    B, C, H, W = x.shape
    h_split = H // P_parts  # matches `h = x.size(2) // self.P_parts`
    if h_split == 0 or h_split == H:
        # The PyTorch reference would produce NaN for the empty-region mean; guard instead.
        raise ValueError(f"Need 1 <= H // P_parts < H (got H={H}, P_parts={P_parts}).")

    HW = H * W
    split = h_split * W  # upper slab = first h_split rows = first h_split*W lane elements

    # Free, metadata-only reshape: keep H*W contiguous on lanes (lane-dense input).
    x2 = x.reshape(B, C, HW)

    # ---- Per-generation block sizing ------------------------------------------------
    vmem_cap = _vmem_capacity_bytes()
    # Aim for ~VMEM/8 per input block (=> double-buffered input ~VMEM/4), never < 4 MiB.
    target_block_bytes = max(4 << 20, vmem_cap // 8)
    per_batch_bytes = C * HW * x2.dtype.itemsize
    bt_budget = max(1, target_block_bytes // max(1, per_batch_bytes))

    # Keep >= 2 grid steps when B >= 2 so both v7x TensorCores get work
    # (harmless on single-TC v5e/v6e).
    min_grid = 2 if B >= 2 else 1
    bt_grid_cap = max(1, -(-B // min_grid))          # ceil(B / min_grid)
    Bt = max(1, min(B, bt_budget, bt_grid_cap))

    # Bt need not divide B: pad the batch axis (zeros don't affect valid rows).
    Bpad = -(-B // Bt) * Bt
    if Bpad != B:
        x2 = jnp.pad(x2, ((0, Bpad - B), (0, 0), (0, 0)))
    grid = (Bpad // Bt,)

    # Scoped-VMEM limit: enough for the double-buffered input block + output + slack,
    # capped well below physical capacity on every generation.
    vmem_limit = int(min(vmem_cap * 3 // 4,
                         2 * Bt * per_batch_bytes + (8 << 20)))
    vmem_limit = max(vmem_limit, 16 << 20)

    kernel = functools.partial(
        _mgfe_kernel,
        split=split,
        inv_g=1.0 / float(H * W),
        inv_u=1.0 / float(h_split * W),
        inv_l=1.0 / float((H - h_split) * W),
        lane_aligned=(split % 128 == 0),
    )

    out3 = pl.pallas_call(
        kernel,
        out_shape=jax.ShapeDtypeStruct((Bpad, 3, C), x.dtype),
        grid_spec=pltpu.PrefetchScalarGridSpec(
            num_scalar_prefetch=0,
            grid=grid,
            in_specs=[pl.BlockSpec((Bt, C, HW), lambda b: (b, 0, 0))],
            out_specs=pl.BlockSpec((Bt, 3, C), lambda b: (b, 0, 0)),
        ),
        compiler_params=pltpu.CompilerParams(
            dimension_semantics=("parallel",),
            vmem_limit_bytes=vmem_limit),
    )(x2)

    # Free reshape (last two dims contiguous); drop batch padding.
    return out3[:B].reshape(B, 3 * C)


def _init_unused_attn_params(key, feature_dim, P_parts):
    # Mirrors the module's __init__ attention stacks (unused in forward()).
    params = []
    for i in range(P_parts):
        k1, k2, key = jax.random.split(jax.random.fold_in(key, i), 3)
        w1 = jax.random.normal(k1, (feature_dim // 2, feature_dim, 1, 1), jnp.float32) * 0.02
        b1 = jnp.zeros((feature_dim // 2,), jnp.float32)
        w2 = jax.random.normal(k2, (1, feature_dim // 2, 1, 1), jnp.float32) * 0.02
        b2 = jnp.zeros((1,), jnp.float32)
        params.append((w1, b1, w2, b2))
    return params


def _reference(x, P_parts=2):
    B, C, H, W = x.shape
    h = H // P_parts
    g = jnp.mean(x, axis=(2, 3))
    u = jnp.mean(x[:, :, :h, :], axis=(2, 3))
    l = jnp.mean(x[:, :, h:, :], axis=(2, 3))
    return jnp.concatenate([g, u, l], axis=1)


if __name__ == "__main__":
    key = jax.random.PRNGKey(0)

    B, C, H, W = 2, 8, 16, 16   # small synthetic shapes (feature_dim=8)
    P_parts = 2

    kx, kp = jax.random.split(key)
    x = jax.random.normal(kx, (B, C, H, W), jnp.float32)

    _ = _init_unused_attn_params(kp, C, P_parts)  # unused in forward (mirrors __init__)

    out = multi_granular_feature_extractor(x, P_parts=P_parts)
    out = jax.block_until_ready(out)

    ref = _reference(x, P_parts)
    assert out.shape == (B, 3 * C), out.shape
    assert jnp.allclose(out, ref, atol=1e-5, rtol=1e-5), (
        f"max abs err = {jnp.max(jnp.abs(out - ref))}")

    print("KERNEL_OK")
</pallas_src>

<mosaic_0001>
module attributes {stable_mosaic.version = 11 : i64} {
  func.func @_mgfe_kernel(%arg0: i32, %arg1: memref<1x8x256xf32, #tpu.memory_space<vmem>>, %arg2: memref<1x3x8xf32, #tpu.memory_space<vmem>>) attributes {dimension_semantics = [#tpu.dimension_semantics<parallel>], iteration_bounds = array<i64: 2>, scalar_prefetch = 0 : i64, scratch_operands = 0 : i64, tpu.core_type = #tpu.core_type<tc>, window_params = [{transform_indices = @transform_0, window_bounds = array<i64: 1, 8, 256>}, {transform_indices = @transform_1, window_bounds = array<i64: 1, 3, 8>}]} {
    %c0 = arith.constant 0 : index
    %c0_0 = arith.constant 0 : index
    %c0_1 = arith.constant 0 : index
    %0 = vector.load %arg1[%c0, %c0_0, %c0_1] : memref<1x8x256xf32, #tpu.memory_space<vmem>>, vector<1x8x128xf32>
    %cst = arith.constant dense<0.000000e+00> : vector<1x8xf32>
    %1 = vector.multi_reduction <add>, %0, %cst [2] : vector<1x8x128xf32> to vector<1x8xf32>
    %c0_2 = arith.constant 0 : index
    %c0_3 = arith.constant 0 : index
    %c128 = arith.constant 128 : index
    %2 = vector.load %arg1[%c0_2, %c0_3, %c128] : memref<1x8x256xf32, #tpu.memory_space<vmem>>, vector<1x8x128xf32>
    %cst_4 = arith.constant dense<0.000000e+00> : vector<1x8xf32>
    %3 = vector.multi_reduction <add>, %2, %cst_4 [2] : vector<1x8x128xf32> to vector<1x8xf32>
    %4 = arith.addf %1, %3 : vector<1x8xf32>
    %cst_5 = arith.constant 3.906250e-03 : f32
    %5 = vector.broadcast %cst_5 : f32 to vector<1x8xf32>
    %6 = arith.mulf %4, %5 : vector<1x8xf32>
    %7 = vector.shape_cast %6 : vector<1x8xf32> to vector<1x1x8xf32>
    %c0_6 = arith.constant 0 : index
    %c0_7 = arith.constant 0 : index
    %c0_8 = arith.constant 0 : index
    %8 = vector.load %arg2[%c0_6, %c0_7, %c0_8] : memref<1x3x8xf32, #tpu.memory_space<vmem>>, vector<1x1x8xf32>
    tpu.vector_store %arg2[%c0_6, %c0_7, %c0_8], %7 {strides = array<i32>} : memref<1x3x8xf32, #tpu.memory_space<vmem>>, vector<1x1x8xf32>,
    %cst_9 = arith.constant 7.812500e-03 : f32
    %9 = vector.broadcast %cst_9 : f32 to vector<1x8xf32>
    %10 = arith.mulf %1, %9 : vector<1x8xf32>
    %11 = vector.shape_cast %10 : vector<1x8xf32> to vector<1x1x8xf32>
    %c0_10 = arith.constant 0 : index
    %c1 = arith.constant 1 : index
    %c0_11 = arith.constant 0 : index
    %12 = vector.load %arg2[%c0_10, %c1, %c0_11] : memref<1x3x8xf32, #tpu.memory_space<vmem>>, vector<1x1x8xf32>
    tpu.vector_store %arg2[%c0_10, %c1, %c0_11], %11 {strides = array<i32>} : memref<1x3x8xf32, #tpu.memory_space<vmem>>, vector<1x1x8xf32>,
    %cst_12 = arith.constant 7.812500e-03 : f32
    %13 = vector.broadcast %cst_12 : f32 to vector<1x8xf32>
    %14 = arith.mulf %3, %13 : vector<1x8xf32>
    %15 = vector.shape_cast %14 : vector<1x8xf32> to vector<1x1x8xf32>
    %c0_13 = arith.constant 0 : index
    %c2 = arith.constant 2 : index
    %c0_14 = arith.constant 0 : index
    %16 = vector.load %arg2[%c0_13, %c2, %c0_14] : memref<1x3x8xf32, #tpu.memory_space<vmem>>, vector<1x1x8xf32>
    tpu.vector_store %arg2[%c0_13, %c2, %c0_14], %15 {strides = array<i32>} : memref<1x3x8xf32, #tpu.memory_space<vmem>>, vector<1x1x8xf32>,
    return
  }
  func.func @transform_0(%arg0: i32) -> (i32, i32, i32) {
    %c0_i32 = arith.constant 0 : i32
    %c0_i32_0 = arith.constant 0 : i32
    %c0_i32_1 = arith.constant 0 : i32
    return %arg0, %c0_i32, %c0_i32_0 : i32, i32, i32
  }
  func.func @transform_1(%arg0: i32) -> (i32, i32, i32) {
    %c0_i32 = arith.constant 0 : i32
    %c0_i32_0 = arith.constant 0 : i32
    %c0_i32_1 = arith.constant 0 : i32
    return %arg0, %c0_i32, %c0_i32_0 : i32, i32, i32
  }
}

</mosaic_0001>

<bundles_post_ra>
// kernel: tpu_custom_call.1
= control target key start
LH: loop header
LB: loop body
LE: loop exit
PB: predicated region body
PF: predicated region fallthrough
CT: control target
= control target key end

     0   :  { %6 = vsyncpa [#allocation3], 0  ;;  %s458_s0 = inlined_call_operand.hbm [shape: f32[2,8,256], index: 0, kind: input, shape index: {}]   ;;  %s459_s1 = inlined_call_operand.vmem [shape: f32[2,3,8], index: 1, kind: output, shape index: {}]  }
   0x1   :  { %8 = vsyncpa [#allocation3 + $0x1], 0  ;;  %s358_s6 = smov 0   ;;  %s360_s7 = smov 0  }
   0x2   :  { %s362_s8 = smov 0   ;;  %s364_s9 = smov 0  }
   0x3 LB: > { %s377_s10 = sadd.s32 4294967295, %s345_s9   ;;  %s380_s11 = sadd.s32 1, %s345_s9   ;;  %s345_s9 = sphi %s364_s9, %s469_s9   ;;  %s341_s8 = sphi %s362_s8, %s468_s8   ;;  %s337_s7 = sphi %s360_s7, %s467_s7   ;;  %s333_s6 = sphi %s358_s6, %s466_s6  }
   0x4   : > { %s18_s12 = ssub.s32 %s345_s9, %s380_s11  ;;  %s21_s13 = sadd.s32 1, %s341_s8 }
   0x5   : > { %p19_p0 = scmp.eq.s32.totalorder %s18_s12, 0  ;;  %p28_p1 = scmp.ne.s32.totalorder %s341_s8, %s337_s7 }
   0x6   : > { %p29_p2 = scmp.eq.s32.totalorder %s345_s9, 0  ;;  %p34_p3 = scmp.ne.s32.totalorder %s337_s7, %s333_s6 }
   0x7   : > { %s390_s14 = scalar_select %p19_p0, %s341_s8, %s21_s13  }
   0x8   : > { %p30_p4 = por %p29_p2, %p28_p1  ;;  %p35_p5 = scmp.eq.s32.totalorder %s377_s10, 0 }
   0x9   : > { %p250_p6 = scmp.lt.s32.totalorder %s345_s9, 2  ;;  %s84_s16 = sand.u32 1, %s341_s8  }
   0xa   : > { %p394_p7 = por %p35_p5, %p34_p3  ;;  %s235_s17 = sshll.u32 %s84_s16, 4 }
   0xb   : > { %s243_s18 = sshll.u32 %s345_s9, 8  ;;  %s88_s22 = scalar_lea.vmem [#allocation2], %s235_s17 }
   0xc   : > { %s461_s15 = scalar_select %p394_p7, 1, 0 }
   0xd   : > { %s403_s21 = scalar_lea.hbm %s458_s0, %s243_s18  ;;  %s96_s23 = sshll.u32 %s88_s22, 4  ;;  %s405_s23 = int_to_ptr.vmem [resolvable:$true] %s96_s23 }
   0xe   : > { %p407_p8 = pnand %p250_p6, %p30_p4  ;;  %s85_s25 = scalar_lea.sflag [#allocation3], %s84_s16 }
   0xf   : > { %s283_s26 = scalar_lea.hbm %s403_s21, 256  ;;  %s288_s29 = scalar_lea.hbm %s458_s0, 512 }
  0x10   : > { %p284_p11 = scmp.ne.s32.totalorder %s403_s21, %s283_s26  ;;  %p285_p12 = pneg %p407_p8 }
  0x11   : > { %p289_p1 = scmp.lt.s32.totalorder %s403_s21, %s458_s0  ;;  %p290_p2 = scmp.lt.s32.totalorder %s288_s29, %s283_s26 }
  0x12   : > { %p286_p13 = pnand %p285_p12, %p284_p11 }
  0x13   : > { %p291_p3 = por %p290_p2, %p289_p1 }
  0x14   : > { %p287_p0 = pneg %p286_p13 }
  0x16   : > { %p292_p4 = pnand %p291_p3, %p287_p0 }
  0x18   : > { %295 = shalt.err (!%p292_p4)
}
  0x19   : > { %s296_s3 = scalar_lea.vmem %s405_s23, 256  ;;  %s347_s4 = smov [#allocation2]  }
  0x1a   : > { %p297_p5 = scmp.ne.s32.totalorder %s405_s23, %s296_s3  ;;  %s301_s5 = sshll.u32 %s347_s4, 4  ;;  %s302_s5 = int_to_ptr.vmem [resolvable:$false] %s301_s5 }
  0x1b   : > { %s303_s6 = scalar_lea.vmem %s302_s5, 512  ;;  %p304_p13 = scmp.lt.s32.totalorder %s405_s23, %s302_s5 }
  0x1c   : > { %p299_p6 = pnand %p297_p5, %p285_p12  ;;  %p305_p9 = scmp.lt.s32.totalorder %s303_s6, %s296_s3 }
  0x1e   : > { %p300_p11 = pneg %p299_p6  ;;  %p306_p10 = por %p305_p9, %p304_p13 }
  0x20   : > { %p307_p7 = pnand %p306_p10, %p300_p11 }
  0x22   : > { %310 = shalt.err (!%p307_p7)
}
  0x23   : > { %249 = dma.hbm_to_vmem [thread:$0]  (!%p407_p8), %s403_s21, 256, %s405_s23, %s85_s25  }
  0x24   : > { %p463_p0 = scmp.lt.s32.totalorder %s345_s9, 3  ;;  %p464_p1 = scmp.ge.s32.totalorder %s345_s9, 1 }
  0x26   : > { %p102_p12 = pnand %p464_p1, %p463_p0 }
  0x27   : > { %s107_s12 = sand.u32 (!%p102_p12), 1, %s337_s7   ;;  %p465_p9 = scmp.ne.s32.totalorder (!%p102_p12), %s461_s15, 0 }
  0x28   : > { %105 = sbr.rel (%p102_p12) target bundleno = 196 (0xc4), region = 24  ;;  %s239_s13 = sshll.u32 (!%p102_p12), %s107_s12, 4 }
  0x29   : > { %s108_s16 = scalar_lea.sflag (!%p102_p12), [#allocation3], %s107_s12  ;;  %s111_s17 = scalar_lea.vmem (!%p102_p12), [#allocation2], %s239_s13 }
  0x2d   : > { %328 = dma.done.wait (%p465_p9), %s108_s16, 256  }
  0x2e   : > { %330 = vsyncadd (%p465_p9), %s108_s16, 4294967040  ;;  %v133_v0 = vld [vmem:[%s111_s17] sm:$0xff]  ;;  %v136_v1 = vld [vmem:[%s111_s17 + $0x8] sm:$0xff]  ;;  %p129_p7 = scmp.lt.s32.totalorder %s377_s10, 1  ;;  %v142_v2 = vlaneseq  ;;  %vm149_vm0 = vcmask 57344  }
  0x2f   : > { %134 = vadd.xlane.f32.xlu0 %v133_v0 }
  0x30   : > { %s471_s10 = smov (!%p129_p7, %s377_s10), 1  ;;  %v143_v3 = vand.u32 127, %v142_v2  ;;  %v145_v4 = vshrl.u32 %v142_v2, 7 }
  0x31   : > { %s240_s9 = sshll.u32 %s471_s10, 2 }
  0x32   : > { %v146_v5 = vsub.s32 %v143_v3, %v145_v4  ;;  %s132_s15 = scalar_lea.vmem %s459_s1, %s240_s9 }
  0x33   : > { %137 = vadd.xlane.f32.xlu0 %v136_v1 }
  0xb8   : > { %v135_v6 = vpop.xlane.xlu0 %134 }
  0xb9   : > { %v151_v7 = vmul.f32 0.0078125, %v135_v6 }
  0xbb   : > { %v156_v8 = vrot.slane %v151_v7, %v146_v5 }
  0xbc   : > { %v138_v9 = vpop.xlane.xlu0 %137 }
  0xbd   : > { %158 = vst.msk [vmem:[%s132_s15 + $0x1] sm:$0x1] %vm149_vm0, %v156_v8  ;;  %v139_v10 = vadd.f32 %v138_v9, %v135_v6  ;;  %v159_v11 = vmul.f32 0.0078125, %v138_v9 }
  0xbf   : > { %v140_v12 = vmul.f32 0.00390625, %v139_v10  ;;  %v164_v13 = vrot.slane %v159_v11, %v146_v5 }
  0xc1   : > { %v147_v14 = vrot.slane %v140_v12, %v146_v5  ;;  %166 = vst.msk [vmem:[%s132_s15 + $0x2] sm:$0x1] %vm149_vm0, %v164_v13 }
  0xc3   : > { %150 = vst.msk [vmem:[%s132_s15] sm:$0x1] %vm149_vm0, %v147_v14 }
  0xc4 PF: > { %p11_p8 = scmp.ge.s32.totalorder %s380_s11, 4   ;;  %s466_s6 = smov %s337_s7 }
  0xc5   : > { %s467_s7 = smov %s341_s8  ;;  %s468_s8 = smov %s390_s14 }
  0xc6   : > { %s469_s9 = smov %s380_s11  ;;  %13 = sbr.rel (!%p11_p8) target bundleno = 3 (0x3), region = 64 }
  0xcb   :  { %186 = vsyncpa [#allocation3], 1 }
  0xcc   :  { %188 = vsyncpa [#allocation3 + $0x1], 1 }

</bundles_post_ra>
